<compile_context>
chip_gen: v7x
topology: tpu7x:2x2x1
jax: 0.10.0
libtpu: 0.0.40
codegen_flags: <defaults>
</compile_context>

<pallas_src>
import functools

import jax
import jax.numpy as jnp
from jax.experimental import pallas as pl
from jax.experimental.pallas import tpu as pltpu


def _s32(v: int) -> int:
    """Reinterpret a u32 constant as a signed int32 Python int."""
    v &= 0xFFFFFFFF
    return v - (1 << 32) if v >= (1 << 31) else v


# Odd 32-bit mixing constants (murmur3 / golden-ratio style), as signed ints so
# they are valid int32 literals inside the kernel.
_HASH_C1 = _s32(0x9E3779B1)
_HASH_C2 = _s32(0x85EBCA6B)
_HASH_C3 = _s32(0xC2B2AE35)
_SIGN_MASK = 0x7FFFFFFF  # clears the sign bit so `>>` behaves like a logical shift


def _residual_connection_kernel(seed_ref, ab_ref, x_ref, w_ref, b_ref, o_ref,
                                *, eps: float, dropout_p: float,
                                tm: int, d_model: int):
    # x tile: (tm, D) rows of the flattened [B*S, D] input, kept in f32.
    x = x_ref[...].astype(jnp.float32)
    d = d_model

    alpha = ab_ref[0]   # scalar LayerNormalization.alpha
    bias = ab_ref[1]    # scalar LayerNormalization.bias

    # --- LayerNormalization (PyTorch x.std() -> unbiased, divide by D-1) ---
    mean = jnp.mean(x, axis=-1, keepdims=True)
    diff = x - mean
    var = jnp.sum(diff * diff, axis=-1, keepdims=True) * (1.0 / (d - 1))
    std = jnp.sqrt(var)
    # One divide per ROW (tm x 1) instead of a full-tile divide + scale.
    inv = alpha / (std + eps)
    y = diff * inv + bias

    # --- sublayer: Linear(D, D) on the MXU in bf16, f32 accumulation ---
    # (w_ref is already bf16; y is cast; statistics / residual stay f32.)
    z = jnp.dot(y.astype(jnp.bfloat16), w_ref[...],
                preferred_element_type=jnp.float32) + b_ref[...]

    # --- dropout: Bernoulli keep-mask scaled by 1/keep_prob ---
    # Counter-based hash over the *global* element index so every tile (and
    # every seed) gets an independent mask.  Pure int32 jnp ops -> lowers on
    # TPU Mosaic and in interpret mode alike.
    if dropout_p > 0.0:
        keep_prob = 1.0 - dropout_p
        thresh24 = jnp.int32(int(keep_prob * (1 << 24)))  # integer threshold
        seed = seed_ref[0]

        rows = jax.lax.broadcasted_iota(jnp.int32, z.shape, 0)
        cols = jax.lax.broadcasted_iota(jnp.int32, z.shape, 1)
        row_g = pl.program_id(0) * tm + rows               # global row index
        cnt = row_g * d + cols                              # global element counter

        mask = jnp.int32(_SIGN_MASK)
        h = cnt * jnp.int32(_HASH_C1) + seed
        h = h ^ ((h & mask) >> 16)
        h = h * jnp.int32(_HASH_C2)
        h = h ^ ((h & mask) >> 13)
        h = h * jnp.int32(_HASH_C3)
        r = (h & mask) >> 7                                 # 24 "random" bits, >= 0

        z = jnp.where(r < thresh24, z * (1.0 / keep_prob), 0.0)

    # --- residual add ---
    o_ref[...] = (x + z).astype(o_ref.dtype)


def residual_connection(x, w, b, alpha, bias, *, dropout_p: float,
                        seed: int = 0, eps: float = 1e-6, tm: int = 512,
                        vmem_limit_bytes: int = 48 * 1024 * 1024):
    """x: [B, S, D] float32.  Returns x + dropout(Linear(LayerNorm(x)))."""
    B, S, D = x.shape
    assert D % 128 == 0, "hidden size must be lane-aligned (multiple of 128)"
    n_rows = B * S

    # Row tile: as large as the input allows (big tiles feed the MXU and
    # amortize the ~0.35us per-grid-step overhead), rounded to the 8-sublane
    # granule; rows are padded to a multiple of the tile so any B*S works.
    tm_eff = max(8, min(tm, n_rows))
    tm_eff = (tm_eff // 8) * 8
    n_pad = pl.cdiv(n_rows, tm_eff) * tm_eff

    x2 = x.reshape(n_rows, D)
    if n_pad != n_rows:
        x2 = jnp.pad(x2, ((0, n_pad - n_rows), (0, 0)))

    # bf16 weights: halves the (constant-index-map, so never re-DMA'd) weight
    # buffer footprint in VMEM and gives full-rate bf16 MXU throughput.
    w_bf16 = w.astype(jnp.bfloat16)
    b2 = b.reshape(1, D).astype(jnp.float32)
    seed_arr = jnp.array([seed], dtype=jnp.int32)
    ab_arr = jnp.array([float(alpha), float(bias)], dtype=jnp.float32)

    kernel = functools.partial(_residual_connection_kernel, eps=eps,
                               dropout_p=float(dropout_p), tm=tm_eff, d_model=D)

    out = pl.pallas_call(
        kernel,
        out_shape=jax.ShapeDtypeStruct((n_pad, D), x.dtype),
        grid_spec=pl.GridSpec(
            grid=(n_pad // tm_eff,),
            in_specs=[
                pl.BlockSpec(memory_space=pltpu.SMEM),           # seed (scalar)
                pl.BlockSpec(memory_space=pltpu.SMEM),           # [alpha, bias]
                pl.BlockSpec((tm_eff, D), lambda i: (i, 0)),     # x row tile
                pl.BlockSpec((D, D), lambda i: (0, 0)),          # sublayer weight (bf16)
                pl.BlockSpec((1, D), lambda i: (0, 0)),          # sublayer bias
            ],
            out_specs=pl.BlockSpec((tm_eff, D), lambda i: (i, 0)),
        ),
        compiler_params=pltpu.CompilerParams(
            # Row tiles are fully independent -> shard across TensorCores on v7x.
            dimension_semantics=("parallel",),
            vmem_limit_bytes=vmem_limit_bytes),
    )(seed_arr, ab_arr, x2, w_bf16, b2)

    out = out[:n_rows]
    return out.reshape(B, S, D)


def _reference_no_dropout(x, w, b, alpha, bias, eps=1e-6):
    """Pure-JAX reference (eval mode), using the same bf16 matmul precision."""
    mean = jnp.mean(x, axis=-1, keepdims=True)
    std = jnp.std(x, axis=-1, ddof=1, keepdims=True)   # unbiased, like torch .std()
    y = alpha * (x - mean) / (std + eps) + bias
    z = jnp.dot(y.astype(jnp.bfloat16), w.astype(jnp.bfloat16),
                preferred_element_type=jnp.float32) + b
    return x + z


if __name__ == "__main__":
    # Small shapes consistent with a transformer residual block.
    B, S, D = 2, 8, 128
    key = jax.random.PRNGKey(0)
    kx, kw, kb = jax.random.split(key, 3)

    x = jax.random.normal(kx, (B, S, D), dtype=jnp.float32)

    # Deterministic parameter init.
    alpha = 1.0   # LayerNormalization.alpha = ones(1)
    beta = 0.0    # LayerNormalization.bias  = zeros(1)
    w = jax.random.normal(kw, (D, D), dtype=jnp.float32) * (1.0 / jnp.sqrt(D))
    b = jax.random.normal(kb, (D,), dtype=jnp.float32) * 0.02

    # Correctness check with dropout disabled (eval-mode semantics).
    out_eval = jax.block_until_ready(
        residual_connection(x, w, b, alpha, beta, dropout_p=0.0))
    ref = _reference_no_dropout(x, w, b, alpha, beta)
    assert jnp.allclose(out_eval, ref, atol=2e-2, rtol=2e-2), "mismatch vs reference"

    # Training-mode run with dropout p=0.1 (in-kernel counter-hash mask).
    out_train = jax.block_until_ready(
        residual_connection(x, w, b, alpha, beta, dropout_p=0.1, seed=123))
    assert out_train.shape == (B, S, D)
    assert bool(jnp.all(jnp.isfinite(out_train)))
    # Dropped elements leave the residual untouched (out == x); rate ~ p.
    frac_dropped = float(jnp.mean((out_train == x).astype(jnp.float32)))
    assert 0.02 < frac_dropped < 0.30, f"dropout rate looks wrong: {frac_dropped}"

    print("KERNEL_OK")
</pallas_src>

<mosaic_0001>
module attributes {stable_mosaic.version = 11 : i64} {
  func.func @_residual_connection_kernel(%arg0: i32, %arg1: memref<1xi32, #tpu.memory_space<smem>>, %arg2: memref<2xf32, #tpu.memory_space<smem>>, %arg3: memref<16x128xf32, #tpu.memory_space<vmem>>, %arg4: memref<128x128xbf16, #tpu.memory_space<vmem>>, %arg5: memref<1x128xf32, #tpu.memory_space<vmem>>, %arg6: memref<16x128xf32, #tpu.memory_space<vmem>>) attributes {dimension_semantics = [#tpu.dimension_semantics<parallel>], iteration_bounds = array<i64: 1>, scalar_prefetch = 0 : i64, scratch_operands = 0 : i64, tpu.core_type = #tpu.core_type<tc>, window_params = [{transform_indices = @transform_0, window_bounds = array<i64: 1>}, {transform_indices = @transform_1, window_bounds = array<i64: 2>}, {transform_indices = @transform_2, window_bounds = array<i64: 16, 128>}, {pipeline_mode = #tpu.pipeline_mode<synchronous>, transform_indices = @transform_3, window_bounds = array<i64: 128, 128>}, {pipeline_mode = #tpu.pipeline_mode<synchronous>, transform_indices = @transform_4, window_bounds = array<i64: 1, 128>}, {transform_indices = @transform_5, window_bounds = array<i64: 16, 128>}]} {
    %c0 = arith.constant 0 : index
    %c0_0 = arith.constant 0 : index
    %0 = vector.load %arg3[%c0, %c0_0] : memref<16x128xf32, #tpu.memory_space<vmem>>, vector<16x128xf32>
    %c0_1 = arith.constant 0 : index
    %1 = memref.load %arg2[%c0_1] : memref<2xf32, #tpu.memory_space<smem>>
    %c1 = arith.constant 1 : index
    %2 = memref.load %arg2[%c1] : memref<2xf32, #tpu.memory_space<smem>>
    %cst = arith.constant dense<0.000000e+00> : vector<16xf32>
    %3 = vector.multi_reduction <add>, %0, %cst [1] : vector<16x128xf32> to vector<16xf32>
    %4 = vector.shape_cast %3 : vector<16xf32> to vector<16x1xf32>
    %cst_2 = arith.constant 1.280000e+02 : f32
    %5 = vector.broadcast %cst_2 : f32 to vector<16x1xf32>
    %6 = arith.divf %4, %5 : vector<16x1xf32>
    %7 = vector.broadcast %6 : vector<16x1xf32> to vector<16x128xf32>
    %8 = arith.subf %0, %7 : vector<16x128xf32>
    %9 = arith.mulf %8, %8 : vector<16x128xf32>
    %cst_3 = arith.constant dense<0.000000e+00> : vector<16xf32>
    %10 = vector.multi_reduction <add>, %9, %cst_3 [1] : vector<16x128xf32> to vector<16xf32>
    %11 = vector.shape_cast %10 : vector<16xf32> to vector<16x1xf32>
    %cst_4 = arith.constant 0.00787401571 : f32
    %12 = vector.broadcast %cst_4 : f32 to vector<16x1xf32>
    %13 = arith.mulf %11, %12 : vector<16x1xf32>
    %14 = math.sqrt %13 : vector<16x1xf32>
    %cst_5 = arith.constant 9.99999997E-7 : f32
    %15 = vector.broadcast %cst_5 : f32 to vector<16x1xf32>
    %16 = arith.addf %14, %15 : vector<16x1xf32>
    %17 = vector.broadcast %1 : f32 to vector<16x1xf32>
    %18 = arith.divf %17, %16 : vector<16x1xf32>
    %19 = vector.broadcast %18 : vector<16x1xf32> to vector<16x128xf32>
    %20 = arith.mulf %8, %19 : vector<16x128xf32>
    %21 = vector.broadcast %2 : f32 to vector<16x128xf32>
    %22 = arith.addf %20, %21 : vector<16x128xf32>
    %23 = arith.truncf %22 : vector<16x128xf32> to vector<16x128xbf16>
    %c0_6 = arith.constant 0 : index
    %c0_7 = arith.constant 0 : index
    %24 = vector.load %arg4[%c0_6, %c0_7] : memref<128x128xbf16, #tpu.memory_space<vmem>>, vector<128x128xbf16>
    %cst_8 = arith.constant dense<0.000000e+00> : vector<16x128xf32>
    %25 = tpu.matmul %23, %24, %cst_8 {dimension_numbers = #tpu.dot_dimension_numbers<[1], [0], [0], [1], [0, 0, 1, 1], [], []>} : vector<16x128xbf16>, vector<128x128xbf16>, vector<16x128xf32> -> vector<16x128xf32>
    %c0_9 = arith.constant 0 : index
    %c0_10 = arith.constant 0 : index
    %26 = vector.load %arg5[%c0_9, %c0_10] : memref<1x128xf32, #tpu.memory_space<vmem>>, vector<1x128xf32>
    %27 = vector.broadcast %26 : vector<1x128xf32> to vector<16x128xf32>
    %28 = arith.addf %25, %27 : vector<16x128xf32>
    %29 = arith.addf %0, %28 : vector<16x128xf32>
    %c0_11 = arith.constant 0 : index
    %c0_12 = arith.constant 0 : index
    %30 = vector.load %arg6[%c0_11, %c0_12] : memref<16x128xf32, #tpu.memory_space<vmem>>, vector<16x128xf32>
    tpu.vector_store %arg6[%c0_11, %c0_12], %29 {strides = array<i32>} : memref<16x128xf32, #tpu.memory_space<vmem>>, vector<16x128xf32>,
    return
  }
  func.func @transform_0(%arg0: i32) -> i32 {
    %c0_i32 = arith.constant 0 : i32
    %c0_i32_0 = arith.constant 0 : i32
    return %c0_i32 : i32
  }
  func.func @transform_1(%arg0: i32) -> i32 {
    %c0_i32 = arith.constant 0 : i32
    %c0_i32_0 = arith.constant 0 : i32
    return %c0_i32 : i32
  }
  func.func @transform_2(%arg0: i32) -> (i32, i32) {
    %c0_i32 = arith.constant 0 : i32
    %c0_i32_0 = arith.constant 0 : i32
    return %arg0, %c0_i32 : i32, i32
  }
  func.func @transform_3(%arg0: i32) -> (i32, i32) {
    %c0_i32 = arith.constant 0 : i32
    %c0_i32_0 = arith.constant 0 : i32
    %c0_i32_1 = arith.constant 0 : i32
    return %c0_i32, %c0_i32_0 : i32, i32
  }
  func.func @transform_4(%arg0: i32) -> (i32, i32) {
    %c0_i32 = arith.constant 0 : i32
    %c0_i32_0 = arith.constant 0 : i32
    %c0_i32_1 = arith.constant 0 : i32
    return %c0_i32, %c0_i32_0 : i32, i32
  }
  func.func @transform_5(%arg0: i32) -> (i32, i32) {
    %c0_i32 = arith.constant 0 : i32
    %c0_i32_0 = arith.constant 0 : i32
    return %arg0, %c0_i32 : i32, i32
  }
}

</mosaic_0001>

<bundles_post_ra>
// kernel: tpu_custom_call.1
= control target key start
LH: loop header
LB: loop body
LE: loop exit
PB: predicated region body
PF: predicated region fallthrough
CT: control target
= control target key end

     0   :  { %11 = vsyncpa [#allocation6], 0  ;;  %s506_s0 = inlined_call_operand.<no memory space> [shape: s32[1], index: 0, kind: input, shape index: {}]   ;;  %s507_s1 = inlined_call_operand.vmem [shape: f32[2], index: 1, kind: input, shape index: {}]   ;;  %s508_s2 = inlined_call_operand.hbm [shape: f32[16,128], index: 2, kind: input, shape index: {}]   ;;  %s509_s3 = inlined_call_operand.hbm [shape: bf16[128,128], index: 3, kind: input, shape index: {}]   ;;  %s510_s4 = inlined_call_operand.vmem [shape: f32[1,128], index: 4, kind: input, shape index: {}]   ;;  %s511_s5 = inlined_call_operand.hbm [shape: f32[16,128], index: 5, kind: output, shape index: {}]  }
   0x1   :  { %12 = vsyncpa [#allocation4], 0 }
   0x2   :  { %13 = vsyncpa [#allocation9], 0 }
   0x3   :  { %14 = vsyncpa [#allocation5], 0  ;;  %s23_s19 = sshll.u32 %s507_s1, 4  ;;  %s24_s19 = int_to_ptr.vmem [resolvable:$true] %s23_s19 }
   0x4   :  { %s312_s20 = scalar_lea.vmem %s24_s19, 16  ;;  %p317_p1 = scmp.lt.s32.totalorder %s24_s19, %s24_s19 }
   0x5   :  { %p313_p0 = scmp.ne.s32.totalorder %s24_s19, %s312_s20  ;;  %p318_p2 = scmp.lt.s32.totalorder %s312_s20, %s312_s20 }
   0x7   :  { %p319_p3 = por %p318_p2, %p317_p1 }
   0x9   :  { %p320_p4 = pnand %p319_p3, %p313_p0 }
   0xb   :  { %323 = shalt.err (!%p320_p4)
}
   0xc   :  { %s398_s21 = smov [#allocation3]   ;;  %s399_s22 = smov [#allocation7]  }
   0xd   :  { %26 = dma.vmem_to_smem %s24_s19, 16, %s398_s21, [#allocation6]  }
   0xe   :  { %s32_s23 = sshll.u32 %s399_s22, 4  ;;  %s324_s26 = scalar_lea.hbm %s508_s2, 256  ;;  %s33_s23 = int_to_ptr.vmem [resolvable:$true] %s32_s23 }
   0xf   :  { %p325_p5 = scmp.ne.s32.totalorder %s508_s2, %s324_s26  ;;  %p328_p6 = scmp.lt.u32.totalorder %s324_s26, %s508_s2 }
  0x11   :  { %p330_p7 = pnand %p328_p6, %p325_p5 }
  0x13   :  { %333 = shalt.err (!%p330_p7)
}
  0x14   :  { %s334_s30 = scalar_lea.vmem %s33_s23, 256  ;;  %p339_p9 = scmp.lt.s32.totalorder %s33_s23, %s33_s23 }
  0x15   :  { %p335_p8 = scmp.ne.s32.totalorder %s33_s23, %s334_s30  ;;  %p340_p10 = scmp.lt.s32.totalorder %s334_s30, %s334_s30 }
  0x17   :  { %p341_p11 = por %p340_p10, %p339_p9 }
  0x19   :  { %p342_p12 = pnand %p341_p11, %p335_p8 }
  0x1b   :  { %345 = shalt.err (!%p342_p12)
}
  0x1c   :  { %s400_s6 = smov 128   ;;  %s401_s7 = smov 8  }
  0x1d   :  { %38 = dma.hbm_to_vmem [thread:$0]  %s508_s2, 256, %s33_s23, [#allocation4], %s400_s6, %s400_s6, %s401_s7  }
  0x1e   :  { %s402_s10 = smov [#allocation8]   ;;  %s346_s14 = scalar_lea.hbm %s509_s3, 1024 }
  0x1f   :  { %s44_s11 = sshll.u32 %s402_s10, 4  ;;  %p347_p13 = scmp.ne.s32.totalorder %s509_s3, %s346_s14  ;;  %s45_s11 = int_to_ptr.vmem [resolvable:$true] %s44_s11 }
  0x20   :  { %p350_p0 = scmp.lt.u32.totalorder %s346_s14, %s509_s3 }
  0x22   :  { %p352_p1 = pnand %p350_p0, %p347_p13 }
  0x24   :  { %355 = shalt.err (!%p352_p1)
}
  0x25   :  { %s356_s18 = scalar_lea.vmem %s45_s11, 1024  ;;  %p361_p3 = scmp.lt.s32.totalorder %s45_s11, %s45_s11 }
  0x26   :  { %p357_p2 = scmp.ne.s32.totalorder %s45_s11, %s356_s18  ;;  %p362_p4 = scmp.lt.s32.totalorder %s356_s18, %s356_s18 }
  0x28   :  { %p363_p5 = por %p362_p4, %p361_p3 }
  0x2a   :  { %p364_p6 = pnand %p363_p5, %p357_p2 }
  0x2c   :  { %367 = shalt.err (!%p364_p6)
}
  0x2d   :  { %s403_s2 = smov 64   ;;  %s404_s19 = smov 4  }
  0x2e   :  { %50 = dma.hbm_to_vmem [thread:$0]  %s509_s3, 1024, %s45_s11, [#allocation9], %s403_s2, %s403_s2, %s404_s19  }
  0x2f   :  { %390 = dma.done.wait [#allocation6], 16  }
  0x30   :  { %391 = vsyncadd [#allocation6], 4294967280 }
  0x31   :  { %392 = dma.done.wait [#allocation4], 256  }
  0x32   :  { %393 = vsyncadd [#allocation4], 4294967040 }
  0x33   :  { %394 = dma.done.wait [#allocation9], 1024  }
  0x34   :  { %395 = vsyncadd [#allocation9], 4294966272 }
  0x35   :  { %62 = sfence }
  0x36   :  { %v468_v0 = vld [vmem:[#allocation7] sm:$0xff]  ;;  %v470_v1 = vld [vmem:[#allocation7 + $0x8] sm:$0xff]  ;;  %v296_v10 = vld [vmem:[#allocation8] sm:$0xff]   ;;  %v405_v11 = vmov 0.0   ;;  %vm406_vm0 = vmmov 0   ;;  %s66_s3 = sld [smem:[#allocation3]] }
  0x37   :  { %68 = vadd.xlane.f32.xlu0 %v468_v0  ;;  %266 = vmatprep.subr.bf16.mxu0 %v405_v11  ;;  %v297_v12 = vld [vmem:[#allocation8 + $0x8] sm:$0xff]   ;;  %v298_v13 = vld [vmem:[#allocation8 + $0x10] sm:$0xff]   ;;  %v299_v14 = vld [vmem:[#allocation8 + $0x18] sm:$0xff]   ;;  %s247_s22 = sld [smem:[#allocation3 + $0x1]]  ;;  %s407_s25 = smov [#allocation10]  }
  0x38   :  { %267 = vmatpush3.bf16.msra.mxu0 %v296_v10  ;;  %v300_v15 = vld [vmem:[#allocation8 + $0x20] sm:$0xff]   ;;  %282 = vmatprep.mubr.msk.bf16.mxu0 %vm406_vm0, %v405_v11  ;;  %v301_v16 = vld [vmem:[#allocation8 + $0x28] sm:$0xff]   ;;  %v302_v17 = vld [vmem:[#allocation8 + $0x30] sm:$0xff]   ;;  %s233_s26 = sshll.u32 %s407_s25, 4  ;;  %s234_s26 = int_to_ptr.vmem [resolvable:$true] %s233_s26 }
  0x39   :  { %268 = vmatprep.subr.bf16.mxu0 %v405_v11  ;;  %v303_v18 = vld [vmem:[#allocation8 + $0x38] sm:$0xff]   ;;  %v248_v46 = vld [vmem:[%s510_s4] ss:$0 sm:$0xff]  ;;  %s368_s27 = scalar_lea.vmem %s234_s26, 256  ;;  %p373_p8 = scmp.lt.s32.totalorder %s234_s26, %s234_s26 }
  0x3a   :  { %p369_p7 = scmp.ne.s32.totalorder %s234_s26, %s368_s27  ;;  %p374_p9 = scmp.lt.s32.totalorder %s368_s27, %s368_s27 }
  0x3b   :  { %70 = vadd.xlane.f32.xlu0 %v470_v1 }
  0x3c   :  { %269 = vmatpush3.bf16.msra.mxu0 %v297_v12  ;;  %v101_v35 = vstv %s66_s3  ;;  %p375_p10 = por %p374_p9, %p373_p8 }
  0x3d   :  { %270 = vmatprep.subr.bf16.mxu0 %v405_v11  ;;  %v108_v41 = vstv %s247_s22 }
  0x3e   :  { %p376_p11 = pnand %p375_p10, %p369_p7 }
  0x40   :  { %271 = vmatpush3.bf16.msra.mxu0 %v298_v13 }
  0x41   :  { %272 = vmatprep.subr.bf16.mxu0 %v405_v11 }
  0x44   :  { %273 = vmatpush3.bf16.msra.mxu0 %v299_v14 }
  0x45   :  { %274 = vmatprep.subr.bf16.mxu0 %v405_v11 }
  0x48   :  { %275 = vmatpush3.bf16.msra.mxu0 %v300_v15 }
  0x49   :  { %276 = vmatprep.subr.bf16.mxu0 %v405_v11 }
  0x4c   :  { %277 = vmatpush3.bf16.msra.mxu0 %v301_v16 }
  0x4d   :  { %278 = vmatprep.subr.bf16.mxu0 %v405_v11 }
  0x50   :  { %279 = vmatpush3.bf16.msra.mxu0 %v302_v17 }
  0x51   :  { %280 = vmatprep.subr.bf16.mxu0 %v405_v11 }
  0x54   :  { %281 = vmatpush3.bf16.msra.mxu0 %v303_v18 }
  0xc4   :  { %v69_v2 = vpop.xlane.xlu0 %68 }
  0xc5   :  { %v73_v3 = vmul.f32 0.0078125, %v69_v2 }
  0xc7   :  { %v475_v4 = vsub.f32 %v468_v0, %v73_v3 }
  0xc8   :  { %v71_v5 = vpop.xlane.xlu0 %70 }
  0xc9   :  { %v74_v6 = vmul.f32 0.0078125, %v71_v5  ;;  %v77_v7 = vmul.f32 %v475_v4, %v475_v4 }
  0xcb   :  { %v480_v8 = vsub.f32 %v470_v1, %v74_v6  ;;  %79 = vadd.xlane.f32.xlu1 %v77_v7 }
  0xcd   :  { %v78_v9 = vmul.f32 %v480_v8, %v480_v8 }
  0xcf   :  { %81 = vadd.xlane.f32.xlu1 %v78_v9 }
 0x158   :  { %v80_v19 = vpop.xlane.xlu1 %79 }
 0x159   :  { %v83_v20 = vmul.f32 0.007874016, %v80_v19 }
 0x15b   :  { %304 = vrsqrt.f32 %v83_v20  ;;  %vm87_vm1 = vcmp.eq.f32.partialorder %v83_v20, inf  ;;  %v90_v25 = vand.u32 2147483648, %v83_v20  ;;  %vm89_vm2 = vcmp.eq.f32.partialorder %v83_v20, 0.0 }
 0x15c   :  { %v82_v21 = vpop.xlane.xlu1 %81 }
 0x15d   :  { %v84_v22 = vmul.f32 0.007874016, %v82_v21 }
 0x15f   :  { %306 = vrsqrt.f32 %v84_v22  ;;  %vm94_vm3 = vcmp.eq.f32.partialorder %v84_v22, inf  ;;  %v97_v31 = vand.u32 2147483648, %v84_v22  ;;  %vm96_vm4 = vcmp.eq.f32.partialorder %v84_v22, 0.0 }
 0x165   :  { %v305_v23 = vpop.eup %304 }
 0x166   :  { %v86_v24 = vmul.f32 %v305_v23, %v83_v20 }
 0x168   :  { %v88_v26 = vsel %vm87_vm1, %v83_v20, %v86_v24 }
 0x169   :  { %v307_v27 = vpop.eup %306  ;;  %v91_v28 = vsel %vm89_vm2, %v90_v25, %v88_v26 }
 0x16a   :  { %v99_v29 = vadd.f32 1e-06, %v91_v28  ;;  %v93_v30 = vmul.f32 %v307_v27, %v84_v22 }
 0x16c   :  { %v95_v32 = vsel %vm94_vm3, %v84_v22, %v93_v30  ;;  %308 = vrcp.f32 %v99_v29 }
 0x16d   :  { %v98_v33 = vsel %vm96_vm4, %v97_v31, %v95_v32 }
 0x16e   :  { %v100_v34 = vadd.f32 1e-06, %v98_v33 }
 0x170   :  { %310 = vrcp.f32 %v100_v34 }
 0x176   :  { %v309_v36 = vpop.eup %308 }
 0x177   :  { %v103_v37 = vmul.f32 %v309_v36, %v101_v35 }
 0x179   :  { %v106_v40 = vmul.f32 %v103_v37, %v475_v4 }
 0x17a   :  { %v311_v38 = vpop.eup %310 }
 0x17b   :  { %v105_v39 = vmul.f32 %v311_v38, %v101_v35  ;;  %v109_v43 = vadd.f32 %v108_v41, %v106_v40 }
 0x17d   :  { %v107_v42 = vmul.f32 %v105_v39, %v480_v8 }
 0x17f   :  { %v110_v44 = vadd.f32 %v108_v41, %v107_v42 }
 0x181   :  { %v111_v45 = vpack.c.bf16 %v110_v44, %v109_v43 }
 0x183   :  { %283 = vmatmul.mubr.bf16.vlgmr.msra.gmra.mrb[0].mxu0 %v111_v45 }
 0x256   :  { %v217_v47 = vpop.f32.mrb[0].mxu0 }
 0x257   :  { %v218_v48 = vadd.f32 %v248_v46, %v217_v47  ;;  %v284_v49 = vpop.f32.mrb[1].mxu0 }
 0x258   :  { %v220_v50 = vpop.f32.mrb[2].mxu0 }
 0x259   :  { %v221_v51 = vadd.f32 %v248_v46, %v220_v50  ;;  %v285_v52 = vpop.f32.mrb[3].mxu0  ;;  %v224_v53 = vadd.f32 %v218_v48, %v468_v0 }
 0x25b   :  { %v225_v54 = vadd.f32 %v221_v51, %v470_v1  ;;  %226 = vst [vmem:[#allocation10] sm:$0xff] %v224_v53 }
 0x25d   :  { %227 = vst [vmem:[#allocation10 + $0x8] sm:$0xff] %v225_v54 }
 0x25e   :  { %379 = shalt.err (!%p376_p11)
}
 0x25f   :  { %s380_s1 = scalar_lea.hbm %s511_s5, 256 }
 0x260   :  { %p381_p12 = scmp.ne.s32.totalorder %s511_s5, %s380_s1  ;;  %p384_p13 = scmp.lt.u32.totalorder %s380_s1, %s511_s5 }
 0x262   :  { %p386_p0 = pnand %p384_p13, %p381_p12 }
 0x264   :  { %389 = shalt.err (!%p386_p0)
}
 0x265   :  { %239 = dma.vmem_to_hbm [thread:$0]  %s234_s26, 256, %s511_s5, [#allocation5], %s400_s6, %s400_s6, %s401_s7  }
 0x266   :  { %396 = dma.done.wait [#allocation5], 256  }
 0x267   :  { %397 = vsyncadd [#allocation5], 4294967040 }
 0x268   :  { %243 = vsyncpa [#allocation4], 1 }
 0x269   :  { %244 = vsyncpa [#allocation9], 1 }
 0x26a   :  { %245 = vsyncpa [#allocation5], 1 }
 0x26b   :  { %246 = vsyncpa [#allocation6], 1 }

</bundles_post_ra>
